<compile_context>
chip_gen: v7x
topology: tpu7x:2x2x1
jax: 0.10.0
libtpu: 0.0.40
codegen_flags: <defaults>
</compile_context>

<pallas_src>
import math
import numpy as np
import jax
import jax.numpy as jnp
from jax.experimental import pallas as pl
from jax.experimental.pallas import tpu as pltpu

# ----------------------------- configuration ---------------------------------------
NODE_DIM   = 32
HIDDEN_DIM = 16
EDGE_IRREPS   = [(16, 0, 1), (8, 1, -1), (4, 2, 1)]        # (mul, l, parity)
HID_MUL       = 8
HIDDEN_IRREPS = [(HID_MUL, 0, 1), (HID_MUL, 1, -1), (HID_MUL, 2, 1)]
ORDER       = 2
OUT_LS      = [0, 1, 2]                                    # rtp('ij','1o','1o') -> 1x0e+1x1e+1x2e
OUT_DIM_SPH = sum(2 * l + 1 for l in OUT_LS)               # 9
OUT_OFFS    = {0: 0, 1: 1, 2: 4}
OUT_CART    = 9                                            # flattened 3x3 cartesian tensor

D_IN     = sum(m * (2 * l + 1) for m, l, _ in EDGE_IRREPS)     # 60
HID_OFFS = [0, HID_MUL, 4 * HID_MUL]                           # hidden offsets of 0e / 1o / 2e
D_H      = sum(m * (2 * l + 1) for m, l, _ in HIDDEN_IRREPS)   # 72

NUM_NODES  = 16
NUM_GRAPHS = 2
# Node tiles up to 256 amortize the ~0.35us/grid-step overhead; the tile is shrunk for small N
# in the wrapper so padded-row compute is not wasted.
MAX_TILE_N = 256


def _round_up(x, m):
    return (x + m - 1) // m * m


# ----------------------------- real Wigner-3j (l <= 2) -------------------------------
# TODO(synk): coupling constants re-derived in-script (complex CG + real-SH basis change);
# they match e3nn's wigner_3j up to a possible global sign per (l1,l2,l3) block.
def _su2_cg(j1, j2, j3, m1, m2, m3):
    if m3 != m1 + m2:
        return 0.0
    f = lambda n: math.factorial(int(round(n)))
    if (j1 + j2 - j3) < 0 or (j1 - j2 + j3) < 0 or (-j1 + j2 + j3) < 0:
        return 0.0
    pref = math.sqrt((2 * j3 + 1) * f(j1 + j2 - j3) * f(j1 - j2 + j3) * f(-j1 + j2 + j3)
                     / f(j1 + j2 + j3 + 1))
    pref *= math.sqrt(f(j3 + m3) * f(j3 - m3) * f(j1 - m1) * f(j1 + m1) * f(j2 - m2) * f(j2 + m2))
    kmin = int(max(0, j2 - j3 - m1, j1 + m2 - j3))
    kmax = int(min(j1 + j2 - j3, j1 - m1, j2 + m2))
    s = 0.0
    for k in range(kmin, kmax + 1):
        s += (-1) ** k / (f(k) * f(j1 + j2 - j3 - k) * f(j1 - m1 - k) * f(j2 + m2 - k)
                          * f(j3 - j2 + m1 + k) * f(j3 - j1 - m2 + k))
    return pref * s


def _real_basis_U(l):
    U = np.zeros((2 * l + 1, 2 * l + 1), dtype=np.complex128)
    U[l, l] = 1.0
    for m in range(1, l + 1):
        U[l + m, l - m] = 1.0 / math.sqrt(2)
        U[l + m, l + m] = (-1) ** m / math.sqrt(2)
        U[l - m, l - m] = 1j / math.sqrt(2)
        U[l - m, l + m] = -1j * (-1) ** m / math.sqrt(2)
    return U


def real_wigner_3j(l1, l2, l3):
    """Real-basis coupling tensor C[a, b, c] with Frobenius norm 1."""
    CC = np.zeros((2 * l1 + 1, 2 * l2 + 1, 2 * l3 + 1))
    for m1 in range(-l1, l1 + 1):
        for m2 in range(-l2, l2 + 1):
            m3 = m1 + m2
            if -l3 <= m3 <= l3:
                CC[l1 + m1, l2 + m2, l3 + m3] = _su2_cg(l1, l2, l3, m1, m2, m3)
    U1, U2, U3 = _real_basis_U(l1), _real_basis_U(l2), _real_basis_U(l3)
    K = np.einsum("am,bn,cp,mnp->abc", np.conj(U1), np.conj(U2), U3, CC.astype(np.complex128))
    re, im = np.real(K), np.imag(K)
    T = re if np.linalg.norm(re) >= np.linalg.norm(im) else im
    assert abs(np.linalg.norm(K) - np.linalg.norm(T)) < 1e-6 * np.linalg.norm(K)
    return (T / np.linalg.norm(T)).astype(np.float64)


# ----------------------------- TP instructions ('uuw') -------------------------------
# TODO(synk): get_feasible_tp's instruction enumeration/ordering is reconstructed (all feasible
# uuw paths whose output irrep lies in rtp.irreps_out); weights are synthetic so ordering is
# immaterial to the semantics.
INSTRUCTIONS = []
for i1, (_, l1, p1) in enumerate(HIDDEN_IRREPS):
    for i2, (_, l2, p2) in enumerate(HIDDEN_IRREPS):
        for l3 in range(abs(l1 - l2), l1 + l2 + 1):
            if p1 * p2 == 1 and l3 in OUT_LS:                 # rtp.irreps_out are all even parity
                INSTRUCTIONS.append((i1, i2, l3))

TP_OFFS  = [int(x) for x in np.cumsum([0] + [2 * l3 + 1 for (_, _, l3) in INSTRUCTIONS])[:-1]]
D_TP     = sum(2 * l3 + 1 for (_, _, l3) in INSTRUCTIONS)      # 29 (!= 9 => post_trans=True)
W_NUMEL  = len(INSTRUCTIONS) * HID_MUL                         # tp.weight_numel

W3J = {}
for (i1, i2, l3) in INSTRUCTIONS:
    l1, l2 = HIDDEN_IRREPS[i1][1], HIDDEN_IRREPS[i2][1]
    if (l1, l2, l3) not in W3J:
        W3J[(l1, l2, l3)] = real_wigner_3j(l1, l2, l3)

# Expand/contract plan for the 'uuw' tensor product: enumerate every nonzero CG term once and
# share the (commutative, since both TP inputs are the same x_sph) pairwise slab products
# across paths and output l3's (hoisting).
PRODUCT_SLABS = []      # unique unordered (slab_off_a, slab_off_b) column offsets into hidden h
_PROD_IDX = {}
CG_ENTRIES = []         # (product_idx, tp_output_row, CG coefficient)
for k, (i1, i2, l3) in enumerate(INSTRUCTIONS):
    l1, l2 = HIDDEN_IRREPS[i1][1], HIDDEN_IRREPS[i2][1]
    C = W3J[(l1, l2, l3)]
    for m3 in range(2 * l3 + 1):
        r = TP_OFFS[k] + m3
        for m1 in range(2 * l1 + 1):
            for m2 in range(2 * l2 + 1):
                c = float(C[m1, m2, m3])
                if abs(c) < 1e-10:
                    continue
                key = tuple(sorted((HID_OFFS[l1] + m1 * HID_MUL, HID_OFFS[l2] + m2 * HID_MUL)))
                if key not in _PROD_IDX:
                    _PROD_IDX[key] = len(PRODUCT_SLABS)
                    PRODUCT_SLABS.append(key)
                CG_ENTRIES.append((_PROD_IDX[key], r, c))

N_PROD = len(PRODUCT_SLABS)
PPAD   = _round_up(N_PROD * HID_MUL, 128)      # lane-aligned width of the product buffer
ZPAD   = _round_up(D_TP * HID_MUL, 128)        # lane-aligned width of the tp-row buffer (232->256)


# ----------------------------- fused Pallas kernel ------------------------------------
def _general_out_kernel(xsc_ref, xsp_ref, w1_ref, b1_ref, w2e_ref, b2e_ref,
                        wab_ref, m_ref, wcomb_ref, onehot_ref, out_ref):
    # TODO(synk): on v6e/v7x the MXU operands below can be cast to bfloat16 (keep f32
    # accumulation) for ~2x MXU rate / half the HBM bytes; kept f32 here for exact numerics
    # and because v5e has no bf16 VPU/EUP path.
    xsc = xsc_ref[...]
    xsp = xsp_ref[...]

    # gate_mlp: Linear -> SiLU -> Linear.  The second Linear is pre-multiplied offline by the
    # (instruction -> tp-output-row) expansion E, so `wk` is already aligned with the tp rows.
    g = jnp.dot(xsc, w1_ref[...], preferred_element_type=jnp.float32) + b1_ref[...]
    g = g * jax.nn.sigmoid(g)
    wk = jnp.dot(g, w2e_ref[...], preferred_element_type=jnp.float32) + b2e_ref[...]

    # 'uuw' tensor product as expand -> multiply -> contract, kept lane-dense and on the MXU:
    #   AB  = x_spherical @ [W_pre@G1 | W_pre@G2]: lin_out_pre fused with gathering both irrep
    #         slabs of every unique CG product pair (per multiplicity channel u), one matmul.
    #   A*B : all pairwise products, each computed exactly once (full 128-lane utilization);
    #         the A/B split is a 128-lane-aligned slice (free).
    #   @ M : applies the CG coefficients and sums products into the tp-output rows (per u).
    ab  = jnp.dot(xsp, wab_ref[...], preferred_element_type=jnp.float32)    # (tn, 2*PPAD)
    prod = ab[:, :PPAD] * ab[:, PPAD:]
    acc  = jnp.dot(prod, m_ref[...], preferred_element_type=jnp.float32)    # (tn, ZPAD)

    # Per-node external tp weights, then ONE matmul performs the u-reduction, the e3nn path
    # normalization, lin_out_post, the change-of-basis Q and the cartesian [2,0,1] permutation.
    node_cart = jnp.dot(wk * acc, wcomb_ref[...], preferred_element_type=jnp.float32)  # (tn, 9)

    # Fused scatter(atom, batch): per-graph partial sums for this node tile (zero one-hot
    # columns mask the padded tail nodes).
    out_ref[0] = jnp.dot(onehot_ref[...], node_cart, preferred_element_type=jnp.float32)


# ----------------------------- parameters (deterministic, synthetic) ------------------
def init_params(key):
    ks = jax.random.split(key, 8)

    # lin_out_pre (o3.Linear, no bias): per-l weights, e3nn 1/sqrt(fan_in) normalization,
    # producing the kernel-internal m-major hidden layout.
    W_pre = np.zeros((D_IN, D_H), np.float64)
    in_off = 0
    for idx, (mul_in, l, _p) in enumerate(EDGE_IRREPS):
        d = 2 * l + 1
        Wl = np.asarray(jax.random.normal(ks[idx], (mul_in, HID_MUL), jnp.float32), np.float64)
        hid_off = HID_OFFS[l]
        for u in range(mul_in):
            for m in range(d):
                W_pre[in_off + u * d + m,
                      hid_off + m * HID_MUL: hid_off + (m + 1) * HID_MUL] = Wl[u] / math.sqrt(mul_in)
        in_off += mul_in * d

    # gate_mlp: Linear(node_dim->hidden_dim) -> SiLU -> Linear(hidden_dim->tp.weight_numel)
    W1 = jax.random.normal(ks[3], (NODE_DIM, HIDDEN_DIM), jnp.float32) / math.sqrt(NODE_DIM)
    b1 = 0.01 * jax.random.normal(ks[4], (1, HIDDEN_DIM), jnp.float32)
    W2 = np.asarray(jax.random.normal(ks[5], (HIDDEN_DIM, W_NUMEL), jnp.float32),
                    np.float64) / math.sqrt(HIDDEN_DIM)
    b2 = 0.01 * np.asarray(jax.random.normal(ks[6], (1, W_NUMEL), jnp.float32), np.float64)

    # lin_out_post (o3.Linear irreps_tp_out -> irreps_out), fan-in per output irrep type.
    W_post = np.zeros((D_TP, OUT_DIM_SPH), np.float64)
    fan_in = {l3: sum(1 for (_, _, ll) in INSTRUCTIONS if ll == l3) for l3 in OUT_LS}
    wkp = np.asarray(jax.random.normal(ks[7], (len(INSTRUCTIONS),), jnp.float32), np.float64)
    for k, (_, _, l3) in enumerate(INSTRUCTIONS):
        for m in range(2 * l3 + 1):
            W_post[TP_OFFS[k] + m, OUT_OFFS[l3] + m] = wkp[k] / math.sqrt(fan_in[l3])

    # change-of-basis Q of ReducedTensorProducts('ij', i=j='1o'): (9, 3, 3), orthonormal rows.
    Q = np.concatenate([math.sqrt(2 * L + 1) * np.moveaxis(real_wigner_3j(1, 1, L), -1, 0)
                        for L in OUT_LS], axis=0)
    Qflat = Q.reshape(OUT_DIM_SPH, 9).astype(np.float64)
    assert np.allclose(Qflat @ Qflat.T, np.eye(OUT_DIM_SPH), atol=1e-5)

    # ---------------- offline folding of every static linear map --------------------
    # Gather matrices: A = h @ G1, B = h @ G2 select the two irrep slabs of each unique product.
    G1 = np.zeros((D_H, PPAD), np.float64)
    G2 = np.zeros((D_H, PPAD), np.float64)
    for p, (oa, ob) in enumerate(PRODUCT_SLABS):
        for u in range(HID_MUL):
            G1[oa + u, p * HID_MUL + u] = 1.0
            G2[ob + u, p * HID_MUL + u] = 1.0

    # CG contraction: ACC = (A*B) @ M sums c * product into tp-output row r (per channel u).
    Mmat = np.zeros((PPAD, ZPAD), np.float64)
    for (p, r, c) in CG_ENTRIES:
        for u in range(HID_MUL):
            Mmat[p * HID_MUL + u, r * HID_MUL + u] += c

    # Weight expansion: WK = tpw @ E copies each instruction's per-node weights to its rows.
    Emat = np.zeros((W_NUMEL, ZPAD), np.float64)
    for k, (_, _, l3) in enumerate(INSTRUCTIONS):
        for m3 in range(2 * l3 + 1):
            r = TP_OFFS[k] + m3
            for u in range(HID_MUL):
                Emat[k * HID_MUL + u, r * HID_MUL + u] = 1.0

    # Final contraction: u-sum + e3nn ('component'+'element') normalization + lin_out_post
    # + change-of-basis Q + cartesian [2,0,1] (dim=-2) permutation, all in one (ZPAD, 9) matrix.
    perm_rows = [2, 0, 1]
    col_perm = [pr * 3 + c for pr in perm_rows for c in range(3)]
    Wpq = (W_post @ Qflat)[:, col_perm]                                     # (D_TP, 9)
    Wcomb = np.zeros((ZPAD, OUT_CART), np.float64)
    for k, (_, _, l3) in enumerate(INSTRUCTIONS):
        coef = math.sqrt((2 * l3 + 1) / HID_MUL)
        for m3 in range(2 * l3 + 1):
            r = TP_OFFS[k] + m3
            for u in range(HID_MUL):
                Wcomb[r * HID_MUL + u, :] = coef * Wpq[r, :]

    WAB = np.concatenate([W_pre @ G1, W_pre @ G2], axis=1)   # lin_out_pre folded into gathers
    W2E = W2 @ Emat                        # gate Linear-2 folded into the weight expansion
    b2E = b2 @ Emat

    f32 = lambda x: jnp.asarray(np.asarray(x, np.float32))
    return dict(W1=W1, b1=b1, W2E=f32(W2E), b2E=f32(b2E),
                WAB=f32(WAB), M=f32(Mmat), Wcomb=f32(Wcomb))


# ----------------------------- forward wrapper ----------------------------------------
def general_out_forward(params, x_scalar, x_spherical, batch):
    n = x_scalar.shape[0]
    # Adaptive node tile: up to 256 rows (amortizes grid-step overhead), shrunk for small N so
    # padded rows don't dominate the compute.  Per-tile VMEM stays well under 2 MiB.
    tile_n = min(MAX_TILE_N, _round_up(n, 8))
    n_pad = _round_up(n, tile_n)
    num_tiles = n_pad // tile_n

    xsc = jnp.pad(x_scalar, ((0, n_pad - n), (0, 0)))
    xsp = jnp.pad(x_spherical, ((0, n_pad - n), (0, 0)))
    # scatter(atom, batch, dim=0) as a one-hot matmul; zero columns for padded tail nodes.
    onehot_t = jnp.pad(jax.nn.one_hot(batch, NUM_GRAPHS, dtype=jnp.float32).T,
                       ((0, 0), (0, n_pad - n)))

    fused_call = pl.pallas_call(
        _general_out_kernel,
        out_shape=jax.ShapeDtypeStruct((num_tiles, NUM_GRAPHS, OUT_CART), jnp.float32),
        grid=(num_tiles,),
        in_specs=[
            pl.BlockSpec((tile_n, NODE_DIM), lambda i: (i, 0)),
            pl.BlockSpec((tile_n, D_IN), lambda i: (i, 0)),
            pl.BlockSpec((NODE_DIM, HIDDEN_DIM), lambda i: (0, 0)),
            pl.BlockSpec((1, HIDDEN_DIM), lambda i: (0, 0)),
            pl.BlockSpec((HIDDEN_DIM, ZPAD), lambda i: (0, 0)),
            pl.BlockSpec((1, ZPAD), lambda i: (0, 0)),
            pl.BlockSpec((D_IN, 2 * PPAD), lambda i: (0, 0)),
            pl.BlockSpec((PPAD, ZPAD), lambda i: (0, 0)),
            pl.BlockSpec((ZPAD, OUT_CART), lambda i: (0, 0)),
            pl.BlockSpec((NUM_GRAPHS, tile_n), lambda i: (0, i)),
        ],
        out_specs=pl.BlockSpec((1, NUM_GRAPHS, OUT_CART), lambda i: (i, 0, 0)),
        compiler_params=pltpu.CompilerParams(dimension_semantics=("parallel",)),
    )
    partials = fused_call(xsc, xsp, params["W1"], params["b1"], params["W2E"], params["b2E"],
                          params["WAB"], params["M"], params["Wcomb"], onehot_t)

    # Tiny cross-tile reduction + reshape in plain XLA; the cartesian permutation is already
    # folded into Wcomb, so no index_select here.
    return jnp.sum(partials, axis=0).reshape(NUM_GRAPHS, 3, 3)


# ----------------------------- main ----------------------------------------------------
if __name__ == "__main__":
    key = jax.random.PRNGKey(0)
    kp, kx, ksp = jax.random.split(key, 3)
    params = init_params(kp)

    x_scalar = jax.random.normal(kx, (NUM_NODES, NODE_DIM), jnp.float32)
    x_spherical = jax.random.normal(ksp, (NUM_NODES, D_IN), jnp.float32)
    batch = jnp.repeat(jnp.arange(NUM_GRAPHS, dtype=jnp.int32), NUM_NODES // NUM_GRAPHS)

    res = general_out_forward(params, x_scalar, x_spherical, batch)
    res = jax.block_until_ready(res)
    assert res.shape == (NUM_GRAPHS, 3, 3)
    assert bool(jnp.all(jnp.isfinite(res)))

    # Plumbing sanity check: same folded matrices evaluated with plain XLA ops.
    def _ref(p, xsc, xsp, b):
        g = jax.nn.silu(xsc @ p["W1"] + p["b1"])
        wk = g @ p["W2E"] + p["b2E"]
        ab = xsp @ p["WAB"]
        prod = ab[:, :PPAD] * ab[:, PPAD:]
        node = (wk * (prod @ p["M"])) @ p["Wcomb"]
        oh = jax.nn.one_hot(b, NUM_GRAPHS, dtype=jnp.float32).T
        return (oh @ node).reshape(NUM_GRAPHS, 3, 3)

    ref = jax.block_until_ready(_ref(params, x_scalar, x_spherical, batch))
    np.testing.assert_allclose(np.asarray(res), np.asarray(ref), rtol=2e-2, atol=5e-2)
    print("KERNEL_OK")
</pallas_src>

<mosaic_0001>
module attributes {stable_mosaic.version = 11 : i64} {
  func.func @_general_out_kernel(%arg0: i32, %arg1: memref<16x32xf32, #tpu.memory_space<vmem>>, %arg2: memref<16x60xf32, #tpu.memory_space<vmem>>, %arg3: memref<32x16xf32, #tpu.memory_space<vmem>>, %arg4: memref<1x16xf32, #tpu.memory_space<vmem>>, %arg5: memref<16x256xf32, #tpu.memory_space<vmem>>, %arg6: memref<1x256xf32, #tpu.memory_space<vmem>>, %arg7: memref<60x512xf32, #tpu.memory_space<vmem>>, %arg8: memref<256x256xf32, #tpu.memory_space<vmem>>, %arg9: memref<256x9xf32, #tpu.memory_space<vmem>>, %arg10: memref<2x16xf32, #tpu.memory_space<vmem>>, %arg11: memref<1x2x9xf32, #tpu.memory_space<vmem>>) attributes {dimension_semantics = [#tpu.dimension_semantics<parallel>], iteration_bounds = array<i64: 1>, scalar_prefetch = 0 : i64, scratch_operands = 0 : i64, tpu.core_type = #tpu.core_type<tc>, window_params = [{transform_indices = @transform_0, window_bounds = array<i64: 16, 32>}, {transform_indices = @transform_1, window_bounds = array<i64: 16, 60>}, {pipeline_mode = #tpu.pipeline_mode<synchronous>, transform_indices = @transform_2, window_bounds = array<i64: 32, 16>}, {pipeline_mode = #tpu.pipeline_mode<synchronous>, transform_indices = @transform_3, window_bounds = array<i64: 1, 16>}, {pipeline_mode = #tpu.pipeline_mode<synchronous>, transform_indices = @transform_4, window_bounds = array<i64: 16, 256>}, {pipeline_mode = #tpu.pipeline_mode<synchronous>, transform_indices = @transform_5, window_bounds = array<i64: 1, 256>}, {pipeline_mode = #tpu.pipeline_mode<synchronous>, transform_indices = @transform_6, window_bounds = array<i64: 60, 512>}, {pipeline_mode = #tpu.pipeline_mode<synchronous>, transform_indices = @transform_7, window_bounds = array<i64: 256, 256>}, {pipeline_mode = #tpu.pipeline_mode<synchronous>, transform_indices = @transform_8, window_bounds = array<i64: 256, 9>}, {transform_indices = @transform_9, window_bounds = array<i64: 2, 16>}, {transform_indices = @transform_10, window_bounds = array<i64: 1, 2, 9>}]} {
    %c0 = arith.constant 0 : index
    %c0_0 = arith.constant 0 : index
    %0 = vector.load %arg1[%c0, %c0_0] : memref<16x32xf32, #tpu.memory_space<vmem>>, vector<16x32xf32>
    %c0_1 = arith.constant 0 : index
    %c0_2 = arith.constant 0 : index
    %1 = vector.load %arg2[%c0_1, %c0_2] : memref<16x60xf32, #tpu.memory_space<vmem>>, vector<16x60xf32>
    %c0_3 = arith.constant 0 : index
    %c0_4 = arith.constant 0 : index
    %2 = vector.load %arg3[%c0_3, %c0_4] : memref<32x16xf32, #tpu.memory_space<vmem>>, vector<32x16xf32>
    %cst = arith.constant dense<0.000000e+00> : vector<16x16xf32>
    %3 = tpu.matmul %0, %2, %cst {dimension_numbers = #tpu.dot_dimension_numbers<[1], [0], [0], [1], [0, 0, 1, 1], [], []>} : vector<16x32xf32>, vector<32x16xf32>, vector<16x16xf32> -> vector<16x16xf32>
    %c0_5 = arith.constant 0 : index
    %c0_6 = arith.constant 0 : index
    %4 = vector.load %arg4[%c0_5, %c0_6] : memref<1x16xf32, #tpu.memory_space<vmem>>, vector<1x16xf32>
    %5 = vector.broadcast %4 : vector<1x16xf32> to vector<16x16xf32>
    %6 = arith.addf %3, %5 : vector<16x16xf32>
    %7 = arith.negf %6 : vector<16x16xf32>
    %8 = math.exp %7 : vector<16x16xf32>
    %cst_7 = arith.constant 1.000000e+00 : f32
    %9 = vector.broadcast %cst_7 : f32 to vector<16x16xf32>
    %10 = arith.addf %9, %8 : vector<16x16xf32>
    %11 = arith.divf %9, %10 : vector<16x16xf32>
    %12 = arith.mulf %6, %11 : vector<16x16xf32>
    %c0_8 = arith.constant 0 : index
    %c0_9 = arith.constant 0 : index
    %13 = vector.load %arg5[%c0_8, %c0_9] : memref<16x256xf32, #tpu.memory_space<vmem>>, vector<16x256xf32>
    %cst_10 = arith.constant dense<0.000000e+00> : vector<16x256xf32>
    %14 = tpu.matmul %12, %13, %cst_10 {dimension_numbers = #tpu.dot_dimension_numbers<[1], [0], [0], [1], [0, 0, 1, 1], [], []>} : vector<16x16xf32>, vector<16x256xf32>, vector<16x256xf32> -> vector<16x256xf32>
    %c0_11 = arith.constant 0 : index
    %c0_12 = arith.constant 0 : index
    %15 = vector.load %arg6[%c0_11, %c0_12] : memref<1x256xf32, #tpu.memory_space<vmem>>, vector<1x256xf32>
    %16 = vector.broadcast %15 : vector<1x256xf32> to vector<16x256xf32>
    %17 = arith.addf %14, %16 : vector<16x256xf32>
    %c0_13 = arith.constant 0 : index
    %c0_14 = arith.constant 0 : index
    %18 = vector.load %arg7[%c0_13, %c0_14] : memref<60x512xf32, #tpu.memory_space<vmem>>, vector<60x512xf32>
    %cst_15 = arith.constant dense<0.000000e+00> : vector<16x512xf32>
    %19 = tpu.matmul %1, %18, %cst_15 {dimension_numbers = #tpu.dot_dimension_numbers<[1], [0], [0], [1], [0, 0, 1, 1], [], []>} : vector<16x60xf32>, vector<60x512xf32>, vector<16x512xf32> -> vector<16x512xf32>
    %20 = vector.extract_strided_slice %19 {offsets = [0, 0], sizes = [16, 256], strides = [1, 1]} : vector<16x512xf32> to vector<16x256xf32>
    %21 = vector.extract_strided_slice %19 {offsets = [0, 256], sizes = [16, 256], strides = [1, 1]} : vector<16x512xf32> to vector<16x256xf32>
    %22 = arith.mulf %20, %21 : vector<16x256xf32>
    %c0_16 = arith.constant 0 : index
    %c0_17 = arith.constant 0 : index
    %23 = vector.load %arg8[%c0_16, %c0_17] : memref<256x256xf32, #tpu.memory_space<vmem>>, vector<256x256xf32>
    %cst_18 = arith.constant dense<0.000000e+00> : vector<16x256xf32>
    %24 = tpu.matmul %22, %23, %cst_18 {dimension_numbers = #tpu.dot_dimension_numbers<[1], [0], [0], [1], [0, 0, 1, 1], [], []>} : vector<16x256xf32>, vector<256x256xf32>, vector<16x256xf32> -> vector<16x256xf32>
    %25 = arith.mulf %17, %24 : vector<16x256xf32>
    %c0_19 = arith.constant 0 : index
    %c0_20 = arith.constant 0 : index
    %26 = vector.load %arg9[%c0_19, %c0_20] : memref<256x9xf32, #tpu.memory_space<vmem>>, vector<256x9xf32>
    %cst_21 = arith.constant dense<0.000000e+00> : vector<16x9xf32>
    %27 = tpu.matmul %25, %26, %cst_21 {dimension_numbers = #tpu.dot_dimension_numbers<[1], [0], [0], [1], [0, 0, 1, 1], [], []>} : vector<16x256xf32>, vector<256x9xf32>, vector<16x9xf32> -> vector<16x9xf32>
    %c0_22 = arith.constant 0 : index
    %c0_23 = arith.constant 0 : index
    %28 = vector.load %arg10[%c0_22, %c0_23] : memref<2x16xf32, #tpu.memory_space<vmem>>, vector<2x16xf32>
    %cst_24 = arith.constant dense<0.000000e+00> : vector<2x9xf32>
    %29 = tpu.matmul %28, %27, %cst_24 {dimension_numbers = #tpu.dot_dimension_numbers<[1], [0], [0], [1], [0, 0, 1, 1], [], []>} : vector<2x16xf32>, vector<16x9xf32>, vector<2x9xf32> -> vector<2x9xf32>
    %c0_25 = arith.constant 0 : index
    %c0_26 = arith.constant 0 : index
    %c0_27 = arith.constant 0 : index
    %30 = vector.load %arg11[%c0_25, %c0_26, %c0_27] : memref<1x2x9xf32, #tpu.memory_space<vmem>>, vector<1x2x9xf32>
    %31 = vector.shape_cast %30 : vector<1x2x9xf32> to vector<2x9xf32>
    %32 = vector.shape_cast %29 : vector<2x9xf32> to vector<1x2x9xf32>
    tpu.vector_store %arg11[%c0_25, %c0_26, %c0_27], %32 {strides = array<i32>} : memref<1x2x9xf32, #tpu.memory_space<vmem>>, vector<1x2x9xf32>,
    return
  }
  func.func @transform_0(%arg0: i32) -> (i32, i32) {
    %c0_i32 = arith.constant 0 : i32
    %c0_i32_0 = arith.constant 0 : i32
    return %arg0, %c0_i32 : i32, i32
  }
  func.func @transform_1(%arg0: i32) -> (i32, i32) {
    %c0_i32 = arith.constant 0 : i32
    %c0_i32_0 = arith.constant 0 : i32
    return %arg0, %c0_i32 : i32, i32
  }
  func.func @transform_2(%arg0: i32) -> (i32, i32) {
    %c0_i32 = arith.constant 0 : i32
    %c0_i32_0 = arith.constant 0 : i32
    %c0_i32_1 = arith.constant 0 : i32
    return %c0_i32, %c0_i32_0 : i32, i32
  }
  func.func @transform_3(%arg0: i32) -> (i32, i32) {
    %c0_i32 = arith.constant 0 : i32
    %c0_i32_0 = arith.constant 0 : i32
    %c0_i32_1 = arith.constant 0 : i32
    return %c0_i32, %c0_i32_0 : i32, i32
  }
  func.func @transform_4(%arg0: i32) -> (i32, i32) {
    %c0_i32 = arith.constant 0 : i32
    %c0_i32_0 = arith.constant 0 : i32
    %c0_i32_1 = arith.constant 0 : i32
    return %c0_i32, %c0_i32_0 : i32, i32
  }
  func.func @transform_5(%arg0: i32) -> (i32, i32) {
    %c0_i32 = arith.constant 0 : i32
    %c0_i32_0 = arith.constant 0 : i32
    %c0_i32_1 = arith.constant 0 : i32
    return %c0_i32, %c0_i32_0 : i32, i32
  }
  func.func @transform_6(%arg0: i32) -> (i32, i32) {
    %c0_i32 = arith.constant 0 : i32
    %c0_i32_0 = arith.constant 0 : i32
    %c0_i32_1 = arith.constant 0 : i32
    return %c0_i32, %c0_i32_0 : i32, i32
  }
  func.func @transform_7(%arg0: i32) -> (i32, i32) {
    %c0_i32 = arith.constant 0 : i32
    %c0_i32_0 = arith.constant 0 : i32
    %c0_i32_1 = arith.constant 0 : i32
    return %c0_i32, %c0_i32_0 : i32, i32
  }
  func.func @transform_8(%arg0: i32) -> (i32, i32) {
    %c0_i32 = arith.constant 0 : i32
    %c0_i32_0 = arith.constant 0 : i32
    %c0_i32_1 = arith.constant 0 : i32
    return %c0_i32, %c0_i32_0 : i32, i32
  }
  func.func @transform_9(%arg0: i32) -> (i32, i32) {
    %c0_i32 = arith.constant 0 : i32
    %c0_i32_0 = arith.constant 0 : i32
    return %c0_i32, %arg0 : i32, i32
  }
  func.func @transform_10(%arg0: i32) -> (i32, i32, i32) {
    %c0_i32 = arith.constant 0 : i32
    %c0_i32_0 = arith.constant 0 : i32
    %c0_i32_1 = arith.constant 0 : i32
    return %arg0, %c0_i32, %c0_i32_0 : i32, i32, i32
  }
}

</mosaic_0001>

<bundles_post_ra>
// kernel: tpu_custom_call.1
= control target key start
LH: loop header
LB: loop body
LE: loop exit
PB: predicated region body
PF: predicated region fallthrough
CT: control target
= control target key end

     0   :  { %15 = vsyncpa [#allocation3], 0  ;;  %s1467_s0 = inlined_call_operand.vmem [shape: f32[16,32], index: 0, kind: input, shape index: {}]   ;;  %s1468_s1 = inlined_call_operand.vmem [shape: f32[16,60], index: 1, kind: input, shape index: {}]   ;;  %s1469_s2 = inlined_call_operand.vmem [shape: f32[32,16], index: 2, kind: input, shape index: {}]   ;;  %s1470_s3 = inlined_call_operand.vmem [shape: f32[1,16], index: 3, kind: input, shape index: {}]   ;;  %s1471_s4 = inlined_call_operand.vmem [shape: f32[16,256], index: 4, kind: input, shape index: {}]   ;;  %s1472_s5 = inlined_call_operand.vmem [shape: f32[1,256], index: 5, kind: input, shape index: {}]   ;;  %s1473_s6 = inlined_call_operand.vmem [shape: f32[60,512], index: 6, kind: input, shape index: {}]   ;;  %s1474_s7 = inlined_call_operand.hbm [shape: f32[256,256], index: 7, kind: input, shape index: {}]   ;;  %s1475_s8 = inlined_call_operand.vmem [shape: f32[256,9], index: 8, kind: input, shape index: {}]   ;;  %s1476_s9 = inlined_call_operand.vmem [shape: f32[2,16], index: 9, kind: input, shape index: {}]   ;;  %s1477_s10 = inlined_call_operand.hbm [shape: f32[1,2,9], index: 10, kind: output, shape index: {}]  }
   0x1   :  { %16 = vsyncpa [#allocation4], 0  ;;  %s1106_s13 = smov [#allocation2]   ;;  %s1058_s17 = scalar_lea.hbm %s1474_s7, 8192 }
   0x2   :  { %s36_s14 = sshll.u32 %s1106_s13, 4  ;;  %p1059_p0 = scmp.ne.s32.totalorder %s1474_s7, %s1058_s17  ;;  %s37_s14 = int_to_ptr.vmem [resolvable:$true] %s36_s14 }
   0x3   :  { %p1062_p1 = scmp.lt.u32.totalorder %s1058_s17, %s1474_s7 }
   0x5   :  { %p1064_p2 = pnand %p1062_p1, %p1059_p0 }
   0x7   :  { %1067 = shalt.err (!%p1064_p2)
}
   0x8   :  { %s1068_s22 = scalar_lea.vmem %s37_s14, 8192  ;;  %p1073_p4 = scmp.lt.s32.totalorder %s37_s14, %s37_s14 }
   0x9   :  { %p1069_p3 = scmp.ne.s32.totalorder %s37_s14, %s1068_s22  ;;  %p1074_p5 = scmp.lt.s32.totalorder %s1068_s22, %s1068_s22 }
   0xb   :  { %p1075_p6 = por %p1074_p5, %p1073_p4 }
   0xd   :  { %p1076_p7 = pnand %p1075_p6, %p1069_p3 }
   0xf   :  { %1079 = shalt.err (!%p1076_p7)
}
  0x10   :  { %s1107_s23 = smov 256   ;;  %s1108_s24 = smov 16  }
  0x11   :  { %42 = dma.hbm_to_vmem [thread:$0]  %s1474_s7, 8192, %s37_s14, [#allocation3], %s1107_s23, %s1107_s23, %s1108_s24  }
  0x12   :  { %1102 = dma.done.wait [#allocation3], 8192  }
  0x13   :  { %1103 = vsyncadd [#allocation3], 4294959104  ;;  %v1109_v0 = vmov 0.0   ;;  %vm65_vm0 = vcmask 261120   ;;  %v54_v1 = vld [vmem:[%s1469_s2] sm:$0xff]  ;;  %v55_v2 = vld [vmem:[%s1469_s2 + $0x8] sm:$0xff] }
  0x14   :  { %248 = vmatprep.mubr.f32.mxu1 %v1109_v0  ;;  %v56_v3 = vld [vmem:[%s1469_s2 + $0x10] sm:$0xff]  ;;  %v895_v4 = vpack.c.bf16 %v55_v2, %v54_v1  ;;  %v57_v5 = vld [vmem:[%s1469_s2 + $0x18] sm:$0xff]  ;;  %v50_v6 = vld [vmem:[%s1467_s0] sm:$0xff]  ;;  %vm300_vm1 = vcmask 1043456   ;;  %vm1110_vm2 = vmmov 1   ;;  %vm293_vm4 = vcmask 490496  }
  0x15   :  { %v899_v7 = vpack.c.bf16 %v57_v5, %v56_v3  ;;  %885 = vmatprep.mubr.msk.f32.mxu0 %vm65_vm0, %v50_v6  ;;  %v262_v8 = vld [vmem:[%s1473_s6 + $0x8] sm:$0xff]  ;;  %v261_v11 = vld [vmem:[%s1473_s6] sm:$0xff]  ;;  %vm1251_vm3 = vmpackc.low %vm300_vm1, %vm1110_vm2  ;;  %vm177_vm5 = vcmask 130048   ;;  %vm1112_vm6 = vmmov 0   ;;  %s1113_s13 = smov [#allocation5]   ;;  %vm797_vm7 = vcmask 66560  }
  0x16   :  { %v266_v9 = vld [vmem:[%s1473_s6 + $0x28] sm:$0xff]  ;;  %896 = vmatprep.subr.bf16.mxu0 %v895_v4  ;;  %v265_v12 = vld [vmem:[%s1473_s6 + $0x20] sm:$0xff]  ;;  %v264_v33 = vld [vmem:[%s1473_s6 + $0x18] sm:$0xff] }
  0x17   :  { %898 = vmatpush3.bf16.msra.mxu0 %v895_v4  ;;  %v907_v10 = vpack.c.bf16 %v266_v9, %v262_v8  ;;  %v270_v13 = vld [vmem:[%s1473_s6 + $0x48] sm:$0xff]  ;;  %v909_v16 = vpack.c.bf16 %v265_v12, %v261_v11  ;;  %v269_v18 = vld [vmem:[%s1473_s6 + $0x40] sm:$0xff]  ;;  %v268_v34 = vld [vmem:[%s1473_s6 + $0x38] sm:$0xff] }
  0x18   :  { %900 = vmatprep.subr.bf16.mxu0 %v899_v7  ;;  %v274_v14 = vld [vmem:[%s1473_s6 + $0x68] sm:$0xff]  ;;  %v273_v19 = vld [vmem:[%s1473_s6 + $0x60] sm:$0xff]  ;;  %v925_v36 = vpack.c.bf16 %v268_v34, %v264_v33  ;;  %v263_v37 = vld [vmem:[%s1473_s6 + $0x10] sm:$0xff] }
  0x19   :  { %v51_v15 = vld [vmem:[%s1467_s0 + $0x8] sm:$0xff]  ;;  %v911_v17 = vpack.c.bf16 %v274_v14, %v270_v13  ;;  %v913_v22 = vpack.c.bf16 %v273_v19, %v269_v18  ;;  %v277_v24 = vld [vmem:[%s1473_s6 + $0x80] sm:$0xff]  ;;  %v267_v38 = vld [vmem:[%s1473_s6 + $0x30] sm:$0xff] }
  0x1a   :  { %v278_v20 = vld [vmem:[%s1473_s6 + $0x88] sm:$0xff]  ;;  %v281_v25 = vld [vmem:[%s1473_s6 + $0xa0] sm:$0xff]  ;;  %v272_v39 = vld [vmem:[%s1473_s6 + $0x58] sm:$0xff]  ;;  %v927_v42 = vpack.c.bf16 %v267_v38, %v263_v37 }
  0x1b   :  { %902 = vmatpush3.bf16.msra.mxu0 %v899_v7  ;;  %v282_v21 = vld [vmem:[%s1473_s6 + $0xa8] sm:$0xff]  ;;  %v917_v28 = vpack.c.bf16 %v281_v25, %v277_v24  ;;  %v285_v30 = vld [vmem:[%s1473_s6 + $0xc0] sm:$0xff]  ;;  %v276_v40 = vld [vmem:[%s1473_s6 + $0x78] sm:$0xff] }
  0x1c   :  { %908 = vmatprep.subr.bf16.mxu0 %v907_v10  ;;  %v915_v23 = vpack.c.bf16 %v282_v21, %v278_v20  ;;  %v286_v26 = vld [vmem:[%s1473_s6 + $0xc8] sm:$0xff]  ;;  %v289_v31 = vld [vmem:[%s1473_s6 + $0xe0] sm:$0xf]  ;;  %v929_v43 = vpack.c.bf16 %v276_v40, %v272_v39  ;;  %v271_v44 = vld [vmem:[%s1473_s6 + $0x50] sm:$0xff] }
  0x1d   :  { %v290_v27 = vld [vmem:[%s1473_s6 + $0xe8] sm:$0xf]  ;;  %v922_v35 = vpack.c.bf16 %v289_v31, %v285_v30  ;;  %v52_v41 = vld [vmem:[%s1468_s1] sm:$0xff]  ;;  %v275_v45 = vld [vmem:[%s1473_s6 + $0x70] sm:$0xff] }
  0x1e   :  { %886 = vmatmul.mubr.msk.f32.vlgmr.msra.gmra.mrb[0].mxu0 %vm65_vm0, %v51_v15  ;;  %v919_v29 = vpack.c.bf16 %v290_v27, %v286_v26  ;;  %v280_v46 = vld [vmem:[%s1473_s6 + $0x98] sm:$0xff]  ;;  %v931_v48 = vpack.c.bf16 %v275_v45, %v271_v44  ;;  %v53_v49 = vld [vmem:[%s1468_s1 + $0x8] sm:$0xff]  ;;  %v279_v51 = vld [vmem:[%s1473_s6 + $0x90] sm:$0xff]  ;;  %s805_s1 = sshll.u32 %s1113_s13, 4  ;;  %s806_s1 = int_to_ptr.vmem [resolvable:$true] %s805_s1 }
  0x1f   :  { %910 = vmatpush1.bf16.msra.mxu0 %v909_v16  ;;  %377 = vmatprep.mubr.f32.mxu0 %v1109_v0  ;;  %v284_v47 = vld [vmem:[%s1473_s6 + $0xb8] sm:$0xff]  ;;  %v283_v52 = vld [vmem:[%s1473_s6 + $0xb0] sm:$0xff]  ;;  %v162_v60 = vld [vmem:[%s1471_s4 + $0x8] sm:$0xff]  ;;  %s1080_s14 = scalar_lea.vmem %s806_s1, 32  ;;  %p1085_p9 = scmp.lt.s32.totalorder %s806_s1, %s806_s1 }
  0x20   :  { %912 = vmatprep.subr.bf16.mxu0 %v911_v17  ;;  %v933_v50 = vpack.c.bf16 %v284_v47, %v280_v46  ;;  %v288_v53 = vld [vmem:[%s1473_s6 + $0xd8] sm:$0xff]  ;;  %v935_v55 = vpack.c.bf16 %v283_v52, %v279_v51  ;;  %v287_v57 = vld [vmem:[%s1473_s6 + $0xd0] sm:$0xff]  ;;  %v161_v63 = vld [vmem:[%s1471_s4] sm:$0xff]  ;;  %p1081_p8 = scmp.ne.s32.totalorder %s806_s1, %s1080_s14  ;;  %p1086_p10 = scmp.lt.s32.totalorder %s1080_s14, %s1080_s14 }
  0x21   :  { %v292_v54 = vld [vmem:[%s1473_s6 + $0xf8] sm:$0xf]  ;;  %v291_v58 = vld [vmem:[%s1473_s6 + $0xf0] sm:$0xf]  ;;  %v472_v3 = vld [vmem:[#allocation2 + $0x8] sm:$0xff] }
  0x22   :  { %v937_v56 = vpack.c.bf16 %v292_v54, %v288_v53  ;;  %v940_v59 = vpack.c.bf16 %v291_v58, %v287_v57  ;;  %v164_v61 = vld [vmem:[%s1471_s4 + $0x18] sm:$0xff]  ;;  %v163_v1 = vld [vmem:[%s1471_s4 + $0x10] sm:$0xff]  ;;  %v814_v6 = vld [vmem:[%s1470_s3] ss:$0 sm:$0xff]  ;;  %p1087_p11 = por %p1086_p10, %p1085_p9 }
  0x23   :  { %914 = vmatpush1.bf16.msra.mxu0 %v913_v22  ;;  %v903_v62 = vpack.c.bf16 %v164_v61, %v162_v60  ;;  %v905_v2 = vpack.c.bf16 %v163_v1, %v161_v63  ;;  %v474_v4 = vld [vmem:[#allocation2 + $0x18] sm:$0xff]  ;;  %v471_v21 = vld [vmem:[#allocation2] sm:$0xff]  ;;  %v473_v22 = vld [vmem:[#allocation2 + $0x10] sm:$0xff] }
  0x24   :  { %916 = vmatprep.subr.bf16.mxu0 %v915_v23  ;;  %v943_v5 = vpack.c.bf16 %v474_v4, %v472_v3  ;;  %v476_v23 = vld [vmem:[#allocation2 + $0x28] sm:$0xff]  ;;  %v478_v24 = vld [vmem:[#allocation2 + $0x38] sm:$0xff]  ;;  %v945_v26 = vpack.c.bf16 %v473_v22, %v471_v21  ;;  %v477_v30 = vld [vmem:[#allocation2 + $0x30] sm:$0xff]  ;;  %p1088_p12 = pnand %p1087_p11, %p1081_p8 }
  0x25   :  { %904 = vmatprep.subr.bf16.mxu1 %v903_v62  ;;  %v480_v32 = vld [vmem:[#allocation2 + $0x48] sm:$0xff]  ;;  %v482_v33 = vld [vmem:[#allocation2 + $0x58] sm:$0xff]  ;;  %v479_v40 = vld [vmem:[#allocation2 + $0x40] sm:$0xff] }
  0x26   :  { %906 = vmatpush1.bf16.msra.mxu1 %v905_v2  ;;  %v951_v39 = vpack.c.bf16 %v482_v33, %v480_v32  ;;  %v486_v44 = vld [vmem:[#allocation2 + $0x78] sm:$0xff]  ;;  %v485_v51 = vld [vmem:[#allocation2 + $0x70] sm:$0xff]  ;;  %v488_v53 = vld [vmem:[#allocation2 + $0x88] sm:$0xff] }
  0x27   :  { %918 = vmatpush1.bf16.msra.mxu0 %v917_v28  ;;  %944 = vmatprep.subr.bf16.mxu1 %v943_v5  ;;  %v947_v28 = vpack.c.bf16 %v478_v24, %v476_v23  ;;  %v490_v54 = vld [vmem:[#allocation2 + $0x98] sm:$0xff]  ;;  %v487_v57 = vld [vmem:[#allocation2 + $0x80] sm:$0xff]  ;;  %v489_v58 = vld [vmem:[#allocation2 + $0x90] sm:$0xff] }
  0x28   :  { %921 = vmatprep.subr.msk.bf16.mxu0 %vm1251_vm3, %v919_v29  ;;  %v475_v29 = vld [vmem:[#allocation2 + $0x20] sm:$0xff]  ;;  %v494_v60 = vld [vmem:[#allocation2 + $0xb8] sm:$0xff]  ;;  %v961_v61 = vpack.c.bf16 %v489_v58, %v487_v57  ;;  %v493_v1 = vld [vmem:[#allocation2 + $0xb0] sm:$0xff] }
  0x29   :  { %v491_v63 = vld [vmem:[#allocation2 + $0xa0] sm:$0xff]  ;;  %v496_v2 = vld [vmem:[#allocation2 + $0xc8] sm:$0xff]  ;;  %v498_v3 = vld [vmem:[#allocation2 + $0xd8] sm:$0xff] }
  0x2a   :  { %v965_v4 = vpack.c.bf16 %v493_v1, %v491_v63  ;;  %v967_v5 = vpack.c.bf16 %v498_v3, %v496_v2  ;;  %v510_v21 = vld [vmem:[#allocation2 + $0x138] sm:$0xff]  ;;  %v507_v24 = vld [vmem:[#allocation2 + $0x120] sm:$0xff]  ;;  %v516_v32 = vld [vmem:[#allocation2 + $0x168] sm:$0xff] }
  0x2b   :  { %924 = vmatpush1.bf16.msk.msra.mxu0 %vm1251_vm3, %v922_v35  ;;  %v949_v35 = vpack.c.bf16 %v477_v30, %v475_v29  ;;  %v511_v30 = vld [vmem:[#allocation2 + $0x140] sm:$0xff]  ;;  %v518_v33 = vld [vmem:[#allocation2 + $0x178] sm:$0xff]  ;;  %v529_v58 = vld [vmem:[#allocation2 + $0x1d0] sm:$0xff] }
  0x2c   :  { %926 = vmatprep.subr.bf16.mxu0 %v925_v36  ;;  %v527_v57 = vld [vmem:[#allocation2 + $0x1c0] sm:$0xff]  ;;  %v533_v1 = vld [vmem:[#allocation2 + $0x1f0] sm:$0xff] }
  0x2d   :  { %v531_v63 = vld [vmem:[#allocation2 + $0x1e0] sm:$0xff] }
  0x2e   :  { %823 = vmatmul.mubr.msk.f32.vlgmr.msra.gmra.mrb[2].mxu0 %vm293_vm4, %v52_v41  ;;  %v1005_v2 = vpack.c.bf16 %v533_v1, %v531_v63  ;;  %v632_v3 = vld [vmem:[%s1475_s8 + $0x80] sm:$0xff] }
  0x2f   :  { %928 = vmatpush1.bf16.msra.mxu0 %v927_v42  ;;  %383 = vmatprep.mubr.f32.mxu0 %v1109_v0 }
  0x30   :  { %930 = vmatprep.subr.bf16.mxu0 %v929_v43  ;;  %v484_v43 = vld [vmem:[#allocation2 + $0x68] sm:$0xff] }
  0x32   :  { %824 = vmatmul.mubr.msk.f32.gmra.mrb[4].mxu0 %vm293_vm4, %v53_v49 }
  0x33   :  { %932 = vmatpush1.bf16.msra.mxu0 %v931_v48  ;;  %454 = vmatprep.mubr.f32.mxu0 %v1109_v0 }
  0x34   :  { %934 = vmatprep.subr.bf16.mxu0 %v933_v50  ;;  %v483_v50 = vld [vmem:[#allocation2 + $0x60] sm:$0xff] }
  0x37   :  { %936 = vmatpush1.bf16.msra.mxu0 %v935_v55  ;;  %v957_v55 = vpack.c.bf16 %v485_v51, %v483_v50  ;;  %v523_v50 = vld [vmem:[#allocation2 + $0x1a0] sm:$0xff]  ;;  %v525_v51 = vld [vmem:[#allocation2 + $0x1b0] sm:$0xff] }
  0x38   :  { %939 = vmatprep.subr.msk.bf16.mxu0 %vm1251_vm3, %v937_v56  ;;  %v959_v56 = vpack.c.bf16 %v490_v54, %v488_v53  ;;  %v528_v53 = vld [vmem:[#allocation2 + $0x1c8] sm:$0xff]  ;;  %v530_v54 = vld [vmem:[#allocation2 + $0x1d8] sm:$0xff] }
  0x3b   :  { %942 = vmatpush1.bf16.msk.msra.mxu0 %vm1251_vm3, %v940_v59  ;;  %v492_v59 = vld [vmem:[#allocation2 + $0xa8] sm:$0xff] }
  0x3c   :  { %v963_v62 = vpack.c.bf16 %v494_v60, %v492_v59  ;;  %v532_v59 = vld [vmem:[#allocation2 + $0x1e8] sm:$0xff]  ;;  %v534_v60 = vld [vmem:[#allocation2 + $0x1f8] sm:$0xff] }
  0x3e   :  { %827 = vmatmul.mubr.msk.f32.vlgmr.msra.gmra.mrb[6].mxu0 %vm293_vm4, %v52_v41  ;;  %v481_v41 = vld [vmem:[#allocation2 + $0x50] sm:$0xff] }
  0x3f   :  { %460 = vmatprep.mubr.f32.mxu0 %v1109_v0  ;;  %v953_v46 = vpack.c.bf16 %v481_v41, %v479_v40  ;;  %v522_v40 = vld [vmem:[#allocation2 + $0x198] sm:$0xff] }
  0x42   :  { %828 = vmatmul.mubr.msk.f32.gmra.mrb[8].mxu0 %vm293_vm4, %v53_v49  ;;  %v955_v49 = vpack.c.bf16 %v486_v44, %v484_v43  ;;  %v519_v43 = vld [vmem:[#allocation2 + $0x180] sm:$0xff]  ;;  %v521_v44 = vld [vmem:[#allocation2 + $0x190] sm:$0xff] }
  0xf1   :  { %v887_v7 = vpop.f32.mrb[0].mxu0 }
  0xf2   :  { %v144_v8 = vadd.f32 %v887_v7, %v814_v6  ;;  %v138_v9 = vpop.f32.mrb[1].mxu0  ;;  %v497_v7 = vld [vmem:[#allocation2 + $0xd0] sm:$0xff] }
  0xf3   :  { %v139_v10 = vadd.f32 %v814_v6, %v138_v9  ;;  %v495_v6 = vld [vmem:[#allocation2 + $0xc0] sm:$0xff]  ;;  %v502_v9 = vld [vmem:[#allocation2 + $0xf8] sm:$0xff] }
  0xf4   :  { %v818_v11 = vmul.f32 -1.442695, %v144_v8 }
  0xf5   :  { %v817_v12 = vmul.f32 -1.442695, %v139_v10 }
  0xf6   :  { %1050 = vpow2.f32 %v818_v11 }
  0xf7   :  { %1052 = vpow2.f32 %v817_v12  ;;  %v499_v12 = vld [vmem:[#allocation2 + $0xe0] sm:$0xff] }
 0x100   :  { %v1051_v13 = vpop.eup %1050 }
 0x101   :  { %v1053_v14 = vpop.eup %1052  ;;  %v379_v15 = vpop.f32.mrb[2].mxu0  ;;  %v154_v16 = vadd.f32 1.0, %v1051_v13  ;;  %v501_v13 = vld [vmem:[#allocation2 + $0xf0] sm:$0xff] }
 0x102   :  { %v153_v17 = vadd.f32 1.0, %v1053_v14  ;;  %v381_v18 = vpop.f32.mrb[3].mxu0  ;;  %v504_v14 = vld [vmem:[#allocation2 + $0x108] sm:$0xff] }
 0x104   :  { %1054 = vrcp.f32 %v153_v17 }
 0x105   :  { %v385_v19 = vpop.f32.mrb[4].mxu0  ;;  %1056 = vrcp.f32 %v154_v16  ;;  %v973_v16 = vpack.c.bf16 %v501_v13, %v499_v12  ;;  %v637_v12 = vld [vmem:[%s1475_s8 + $0xa8] sm:$0xff] }
 0x106   :  { %v387_v20 = vpop.f32.mrb[5].mxu0 }
 0x10e   :  { %v1055_v25 = vpop.eup %1054 }
 0x10f   :  { %v159_v27 = vmul.f32 %v1055_v25, %v139_v10  ;;  %v1057_v31 = vpop.eup %1056  ;;  %v969_v10 = vpack.c.bf16 %v497_v7, %v495_v6  ;;  %v509_v25 = vld [vmem:[#allocation2 + $0x130] sm:$0xff] }
 0x110   :  { %v160_v38 = vmul.f32 %v1057_v31, %v144_v8  ;;  %v500_v8 = vld [vmem:[#allocation2 + $0xe8] sm:$0xff]  ;;  %v513_v31 = vld [vmem:[#allocation2 + $0x150] sm:$0xff] }
 0x111   :  { %819 = vmatmul.mubr.msk.f32.vlgmr.msra.gmra.mrb[0].mxu1 %vm177_vm5, %v159_v27  ;;  %v456_v34 = vpop.f32.mrb[6].mxu0  ;;  %v971_v11 = vpack.c.bf16 %v502_v9, %v500_v8  ;;  %v514_v27 = vld [vmem:[#allocation2 + $0x158] sm:$0xff]  ;;  %v618_v9 = vld [vmem:[%s1475_s8 + $0x10] sm:$0xff] }
 0x112   :  { %946 = vmatpush1.bf16.msra.mxu1 %v945_v26  ;;  %254 = vmatprep.mubr.f32.mxu1 %v1109_v0  ;;  %v1341_v36 = vmul.f32 %v456_v34, %v379_v15  ;;  %v458_v37 = vpop.f32.mrb[7].mxu0  ;;  %v506_v15 = vld [vmem:[#allocation2 + $0x118] sm:$0xff]  ;;  %v512_v26 = vld [vmem:[#allocation2 + $0x148] sm:$0xff]  ;;  %v985_v34 = vpack.c.bf16 %v513_v31, %v511_v30 }
 0x113   :  { %948 = vmatprep.subr.bf16.mxu1 %v947_v28  ;;  %v468_v42 = vmul.f32 %v458_v37, %v381_v18  ;;  %v975_v17 = vpack.c.bf16 %v506_v15, %v504_v14  ;;  %v503_v18 = vld [vmem:[#allocation2 + $0x100] sm:$0xff]  ;;  %v981_v28 = vpack.c.bf16 %v509_v25, %v507_v24  ;;  %v983_v29 = vpack.c.bf16 %v514_v27, %v512_v26  ;;  %v641_v24 = vld [vmem:[%s1475_s8 + $0xc8] sm:$0xff]  ;;  %v643_v30 = vld [vmem:[%s1475_s8 + $0xd8] sm:$0xff] }
 0x114   :  { %v515_v37 = vld [vmem:[#allocation2 + $0x160] sm:$0xff] }
 0x115   :  { %820 = vmatmul.mubr.msk.f32.gmra.mrb[2].mxu1 %vm177_vm5, %v160_v38  ;;  %v462_v45 = vpop.f32.mrb[8].mxu0  ;;  %v517_v38 = vld [vmem:[#allocation2 + $0x170] sm:$0xff]  ;;  %v620_v15 = vld [vmem:[%s1475_s8 + $0x20] sm:$0xff] }
 0x116   :  { %950 = vmatpush1.bf16.msra.mxu1 %v949_v35  ;;  %599 = vmatprep.mubr.f32.mxu1 %v468_v42  ;;  %v1344_v47 = vmul.f32 %v462_v45, %v385_v19  ;;  %v464_v48 = vpop.f32.mrb[9].mxu0  ;;  %v505_v19 = vld [vmem:[#allocation2 + $0x110] sm:$0xff]  ;;  %v987_v35 = vpack.c.bf16 %v518_v33, %v516_v32  ;;  %v989_v41 = vpack.c.bf16 %v517_v38, %v515_v37  ;;  %v524_v45 = vld [vmem:[#allocation2 + $0x1a8] sm:$0xff]  ;;  %v624_v27 = vld [vmem:[%s1475_s8 + $0x40] sm:$0xff] }
 0x117   :  { %952 = vmatprep.subr.bf16.mxu1 %v951_v39  ;;  %v1346_v52 = vmul.f32 %v464_v48, %v387_v20  ;;  %v508_v20 = vld [vmem:[#allocation2 + $0x128] sm:$0xff]  ;;  %v977_v22 = vpack.c.bf16 %v505_v19, %v503_v18  ;;  %v993_v48 = vpack.c.bf16 %v521_v44, %v519_v43  ;;  %v639_v18 = vld [vmem:[%s1475_s8 + $0xb8] sm:$0xff]  ;;  %v626_v33 = vld [vmem:[%s1475_s8 + $0x50] sm:$0xff] }
 0x118   :  { %v979_v23 = vpack.c.bf16 %v510_v21, %v508_v20  ;;  %v520_v39 = vld [vmem:[#allocation2 + $0x188] sm:$0xff]  ;;  %v622_v21 = vld [vmem:[%s1475_s8 + $0x30] sm:$0xff]  ;;  %v647_v44 = vld [vmem:[%s1475_s8 + $0xf8] sm:$0xff] }
 0x119   :  { %v991_v42 = vpack.c.bf16 %v522_v40, %v520_v39  ;;  %v645_v37 = vld [vmem:[%s1475_s8 + $0xe8] sm:$0xff]  ;;  %v628_v40 = vld [vmem:[%s1475_s8 + $0x60] sm:$0xff]  ;;  %v646_v43 = vld [vmem:[%s1475_s8 + $0xf0] sm:$0xff] }
 0x11a   :  { %954 = vmatpush1.bf16.msra.mxu1 %v953_v46  ;;  %v526_v46 = vld [vmem:[#allocation2 + $0x1b8] sm:$0xff] }
 0x11b   :  { %956 = vmatprep.subr.bf16.mxu1 %v955_v49  ;;  %v995_v49 = vpack.c.bf16 %v526_v46, %v524_v45  ;;  %v1035_v45 = vpack.c.bf16 %v647_v44, %v646_v43  ;;  %v630_v46 = vld [vmem:[%s1475_s8 + $0x70] sm:$0xff] }
 0x11e   :  { %958 = vmatpush1.bf16.msra.mxu1 %v957_v55  ;;  %v997_v55 = vpack.c.bf16 %v525_v51, %v523_v50 }
 0x11f   :  { %960 = vmatprep.subr.bf16.mxu1 %v959_v56  ;;  %v999_v56 = vpack.c.bf16 %v530_v54, %v528_v53 }
 0x122   :  { %962 = vmatpush1.bf16.msra.mxu1 %v961_v61  ;;  %v1001_v61 = vpack.c.bf16 %v529_v58, %v527_v57  ;;  %v165_v58 = vld [vmem:[%s1472_s5] sm:$0x3] }
 0x123   :  { %964 = vmatprep.subr.bf16.mxu1 %v963_v62  ;;  %v1003_v62 = vpack.c.bf16 %v534_v60, %v532_v59 }
 0x126   :  { %966 = vmatpush1.bf16.msra.mxu1 %v965_v4  ;;  %v633_v4 = vld [vmem:[%s1475_s8 + $0x88] sm:$0xff] }
 0x127   :  { %968 = vmatprep.subr.bf16.mxu1 %v967_v5  ;;  %v616_v5 = vld [vmem:[%s1475_s8] sm:$0xff]  ;;  %v1007_v6 = vpack.c.bf16 %v633_v4, %v632_v3 }
 0x129   :  { %1008 = vmatprep.subr.bf16.mxu0 %v1007_v6 }
 0x12a   :  { %970 = vmatpush1.bf16.msra.mxu1 %v969_v10  ;;  %v619_v10 = vld [vmem:[%s1475_s8 + $0x18] sm:$0xff] }
 0x12b   :  { %972 = vmatprep.subr.bf16.mxu1 %v971_v11  ;;  %v636_v11 = vld [vmem:[%s1475_s8 + $0xa0] sm:$0xff]  ;;  %v1013_v13 = vpack.c.bf16 %v619_v10, %v618_v9 }
 0x12c   :  { %v1015_v14 = vpack.c.bf16 %v637_v12, %v636_v11 }
 0x12e   :  { %974 = vmatpush1.bf16.msra.mxu1 %v973_v16  ;;  %v621_v16 = vld [vmem:[%s1475_s8 + $0x28] sm:$0xff] }
 0x12f   :  { %976 = vmatprep.subr.bf16.mxu1 %v975_v17  ;;  %v638_v17 = vld [vmem:[%s1475_s8 + $0xb0] sm:$0xff]  ;;  %v1017_v19 = vpack.c.bf16 %v621_v16, %v620_v15  ;;  %v723_v16 = vld [vmem:[%s1476_s9] sm:$0x3] }
 0x130   :  { %v1019_v20 = vpack.c.bf16 %v639_v18, %v638_v17 }
 0x132   :  { %978 = vmatpush1.bf16.msra.mxu1 %v977_v22  ;;  %v623_v22 = vld [vmem:[%s1475_s8 + $0x38] sm:$0xff] }
 0x133   :  { %980 = vmatprep.subr.bf16.mxu1 %v979_v23  ;;  %v640_v23 = vld [vmem:[%s1475_s8 + $0xc0] sm:$0xff]  ;;  %v1021_v25 = vpack.c.bf16 %v623_v22, %v622_v21 }
 0x134   :  { %v1023_v26 = vpack.c.bf16 %v641_v24, %v640_v23 }
 0x136   :  { %982 = vmatpush1.bf16.msra.mxu1 %v981_v28  ;;  %v625_v28 = vld [vmem:[%s1475_s8 + $0x48] sm:$0xff] }
 0x137   :  { %984 = vmatprep.subr.bf16.mxu1 %v983_v29  ;;  %v642_v29 = vld [vmem:[%s1475_s8 + $0xd0] sm:$0xff]  ;;  %v1025_v31 = vpack.c.bf16 %v625_v28, %v624_v27 }
 0x138   :  { %v1027_v32 = vpack.c.bf16 %v643_v30, %v642_v29 }
 0x13a   :  { %986 = vmatpush1.bf16.msra.mxu1 %v985_v34  ;;  %v627_v34 = vld [vmem:[%s1475_s8 + $0x58] sm:$0xff] }
 0x13b   :  { %988 = vmatprep.subr.bf16.mxu1 %v987_v35  ;;  %v644_v35 = vld [vmem:[%s1475_s8 + $0xe0] sm:$0xff]  ;;  %v1029_v38 = vpack.c.bf16 %v627_v34, %v626_v33 }
 0x13c   :  { %v1031_v39 = vpack.c.bf16 %v645_v37, %v644_v35 }
 0x13e   :  { %990 = vmatpush1.bf16.msra.mxu1 %v989_v41  ;;  %v629_v41 = vld [vmem:[%s1475_s8 + $0x68] sm:$0xff] }
 0x13f   :  { %992 = vmatprep.subr.bf16.mxu1 %v991_v42  ;;  %v1033_v42 = vpack.c.bf16 %v629_v41, %v628_v40 }
 0x142   :  { %994 = vmatpush1.bf16.msra.mxu1 %v993_v48  ;;  %v631_v48 = vld [vmem:[%s1475_s8 + $0x78] sm:$0xff] }
 0x143   :  { %996 = vmatprep.subr.bf16.mxu1 %v995_v49  ;;  %v1037_v49 = vpack.c.bf16 %v631_v48, %v630_v46 }
 0x146   :  { %998 = vmatpush1.bf16.msra.mxu1 %v997_v55  ;;  %v167_v55 = vlaneseq }
 0x147   :  { %1000 = vmatprep.subr.bf16.mxu1 %v999_v56 }
 0x148   :  { %v168_v56 = vshrl.u32 %v167_v55, 7 }
 0x14a   :  { %1002 = vmatpush1.bf16.msra.mxu1 %v1001_v61  ;;  %v169_v57 = vsub.s32 0, %v168_v56  ;;  %v173_v59 = vsub.s32 1, %v168_v56 }
 0x14b   :  { %1004 = vmatprep.subr.bf16.mxu1 %v1003_v62 }
 0x14c   :  { %v170_v60 = vrot.slane %v165_v58, %v169_v57  ;;  %v174_v61 = vrot.slane %v165_v58, %v173_v59 }
 0x14e   :  { %1006 = vmatpush1.bf16.msra.mxu1 %v1005_v2 }
 0x151   :  { %600 = vmatmul.mubr.f32.vlgmr.msra.gmra.mrb[4].mxu1 %v1341_v36  ;;  %v617_v36 = vld [vmem:[%s1475_s8 + $0x8] sm:$0xff] }
 0x152   :  { %605 = vmatprep.mubr.f32.mxu1 %v1346_v52  ;;  %v635_v52 = vld [vmem:[%s1475_s8 + $0x98] sm:$0xff]  ;;  %v1009_v7 = vpack.c.bf16 %v617_v36, %v616_v5 }
 0x154   :  { %1010 = vmatpush3.bf16.msra.mxu0 %v1009_v7 }
 0x155   :  { %606 = vmatmul.mubr.f32.gmra.mrb[6].mxu1 %v1344_v47  ;;  %v634_v47 = vld [vmem:[%s1475_s8 + $0x90] sm:$0xff] }
 0x156   :  { %v1011_v8 = vpack.c.bf16 %v635_v52, %v634_v47  ;;  %892 = vmatprep.mubr.msk.f32.mxu1 %vm1112_vm6, %v1109_v0 }
 0x158   :  { %1012 = vmatprep.subr.bf16.mxu0 %v1011_v8  ;;  %v1111_v8 = vmov 0.0|0.0  }
 0x159   :  { %1014 = vmatpush3.bf16.msra.mxu0 %v1013_v13  ;;  %1039 = vmatprep.subr.bf16.mxu1 %v1111_v8 }
 0x15a   :  { %1016 = vmatprep.subr.bf16.mxu0 %v1015_v14 }
 0x15d   :  { %1018 = vmatpush3.bf16.msra.mxu0 %v1017_v19 }
 0x15e   :  { %1020 = vmatprep.subr.bf16.mxu0 %v1019_v20 }
 0x161   :  { %1022 = vmatpush3.bf16.msra.mxu0 %v1021_v25 }
 0x162   :  { %1024 = vmatprep.subr.bf16.mxu0 %v1023_v26 }
 0x165   :  { %1026 = vmatpush3.bf16.msra.mxu0 %v1025_v31 }
 0x166   :  { %1028 = vmatprep.subr.bf16.mxu0 %v1027_v32 }
 0x169   :  { %1030 = vmatpush3.bf16.msra.mxu0 %v1029_v38 }
 0x16a   :  { %1032 = vmatprep.subr.bf16.mxu0 %v1031_v39 }
 0x16d   :  { %1034 = vmatpush3.bf16.msra.mxu0 %v1033_v42 }
 0x16e   :  { %1036 = vmatprep.subr.bf16.mxu0 %v1035_v45 }
 0x171   :  { %1038 = vmatpush3.bf16.msra.mxu0 %v1037_v49 }
 0x1e4   :  { %v250_v50 = vpop.f32.mrb[0].mxu1 }
 0x1e5   :  { %v252_v51 = vpop.f32.mrb[1].mxu1  ;;  %v251_v62 = vadd.f32 %v250_v50, %v170_v60 }
 0x1e6   :  { %v253_v63 = vadd.f32 %v252_v51, %v174_v61 }
 0x1e8   :  { %v256_v53 = vpop.f32.mrb[2].mxu1 }
 0x1e9   :  { %v258_v54 = vpop.f32.mrb[3].mxu1  ;;  %v257_v5 = vadd.f32 %v256_v53, %v170_v60 }
 0x1ea   :  { %v259_v6 = vadd.f32 %v258_v54, %v174_v61 }
 0x224   :  { %v601_v1 = vpop.f32.mrb[4].mxu1 }
 0x225   :  { %v612_v2 = vmul.f32 %v601_v1, %v251_v62  ;;  %v603_v3 = vpop.f32.mrb[5].mxu1 }
 0x226   :  { %v613_v4 = vmul.f32 %v603_v3, %v253_v63 }
 0x228   :  { %v607_v36 = vpop.f32.mrb[6].mxu1  ;;  %712 = vmatprep.mubr.f32.mxu0 %v613_v4 }
 0x229   :  { %v614_v47 = vmul.f32 %v607_v36, %v257_v5  ;;  %v609_v52 = vpop.f32.mrb[7].mxu1  ;;  %713 = vmatmul.mubr.f32.vlgmr.msra.gmra.mrb[10].mxu0 %v612_v2 }
 0x22a   :  { %v615_v7 = vmul.f32 %v609_v52, %v259_v6 }
 0x22c   :  { %717 = vmatprep.mubr.f32.mxu0 %v615_v7 }
 0x22d   :  { %718 = vmatmul.mubr.f32.gmra.mrb[12].mxu0 %v614_v47 }
 0x2fc   :  { %v868_v9 = vpop.f32.mrb[10].mxu0 }
 0x2fd   :  { %v869_v10 = vpop.f32.mrb[11].mxu0 }
 0x2fe   :  { %v870_v11 = vadd.f32 %v869_v10, %v868_v9 }
 0x300   :  { %v871_v12 = vpop.f32.mrb[12].mxu0 }
 0x301   :  { %v872_v13 = vpop.f32.mrb[13].mxu0 }
 0x302   :  { %v873_v14 = vadd.f32 %v872_v13, %v871_v12 }
 0x304   :  { %v1040_v15 = vpack.c.bf16 %v873_v14, %v870_v11 }
 0x306   :  { %1041 = vmatpush3.bf16.msra.mxu1 %v1040_v15 }
 0x309   :  { %893 = vmatmul.mubr.msk.f32.vlgmr.msra.gmra.mrb[8].mxu1 %vm177_vm5, %v723_v16 }
 0x3dc   :  { %v793_v17 = vpop.f32.mrb[8].mxu1 }
 0x3dd   :  { %v894_v0 = vpop.f32.mrb[9].mxu1  ;;  %798 = vst.msk [vmem:[#allocation5] sm:$0x3] %vm797_vm7, %v793_v17 }
 0x3de   :  { %1091 = shalt.err (!%p1088_p12)
}
 0x3df   :  { %s1092_s9 = scalar_lea.hbm %s1477_s10, 32 }
 0x3e0   :  { %p1093_p13 = scmp.ne.s32.totalorder %s1477_s10, %s1092_s9  ;;  %p1096_p0 = scmp.lt.u32.totalorder %s1092_s9, %s1477_s10 }
 0x3e2   :  { %p1098_p1 = pnand %p1096_p0, %p1093_p13 }
 0x3e4   :  { %1101 = shalt.err (!%p1098_p1)
}
 0x3e5   :  { %808 = dma.vmem_to_hbm [thread:$0]  %s806_s1, 32, %s1477_s10, [#allocation4]  }
 0x3e6   :  { %1104 = dma.done.wait [#allocation4], 32  }
 0x3e7   :  { %1105 = vsyncadd [#allocation4], 4294967264 }
 0x3e8   :  { %812 = vsyncpa [#allocation3], 1 }
 0x3e9   :  { %813 = vsyncpa [#allocation4], 1 }

</bundles_post_ra>
